<compile_context>
chip_gen: v7x
topology: tpu7x:2x2x1
jax: 0.10.0
libtpu: 0.0.40
codegen_flags: <defaults>
</compile_context>

<pallas_src>
import math

import jax
import jax.numpy as jnp
from jax import lax
from jax.experimental import pallas as pl
from jax.experimental.pallas import tpu as pltpu


def _round_up(x, m):
    return (x + m - 1) // m * m


def _pick_tile(total, cap):
    # total and cap are multiples of 128; return largest multiple of 128
    # that is <= cap and divides total.
    t = min(cap, total)
    while total % t:
        t -= 128
    return t


# ---------------------------------------------------------------------------
# Kernels
# ---------------------------------------------------------------------------
def _noisy_linear_train_kernel(x_ref, wmu_ref, wsig_ref, eps_out_ref, eps_in_ref,
                               bmu_ref, bsig_ref, beps_ref, o_ref, acc_ref):
    k = pl.program_id(1)

    @pl.when(k == 0)
    def _():
        acc_ref[...] = jnp.zeros_like(acc_ref)

    # Rebuild the rank-1 noise tile in VMEM (one VPU broadcast-mul) and fuse
    # the noisy-weight construction with the matmul.
    noise = eps_out_ref[...] * eps_in_ref[...]          # (tn, 1) * (1, tk) -> (tn, tk)
    w = wmu_ref[...] + wsig_ref[...] * noise            # (tn, tk)

    # y += x @ w.T, expressed without materializing the transpose:
    # contract x's dim 1 (in) with w's dim 1 (in)  -> (B, tn)
    acc_ref[...] += lax.dot_general(
        x_ref[...], w,
        dimension_numbers=(((1,), (1,)), ((), ())),
        preferred_element_type=jnp.float32)

    @pl.when(k == pl.num_programs(1) - 1)
    def _():
        b = bmu_ref[...] + bsig_ref[...] * beps_ref[...]   # (1, tn)
        o_ref[...] = (acc_ref[...] + b).astype(o_ref.dtype)


def _linear_eval_kernel(x_ref, wmu_ref, bmu_ref, o_ref, acc_ref):
    k = pl.program_id(1)

    @pl.when(k == 0)
    def _():
        acc_ref[...] = jnp.zeros_like(acc_ref)

    acc_ref[...] += lax.dot_general(
        x_ref[...], wmu_ref[...],
        dimension_numbers=(((1,), (1,)), ((), ())),
        preferred_element_type=jnp.float32)

    @pl.when(k == pl.num_programs(1) - 1)
    def _():
        o_ref[...] = (acc_ref[...] + bmu_ref[...]).astype(o_ref.dtype)


# ---------------------------------------------------------------------------
# Wrapper
# ---------------------------------------------------------------------------
def noisy_linear(x, weight_mu, weight_sigma, eps_out, eps_in,
                 bias_mu, bias_sigma, bias_epsilon, *, training=True,
                 tn_cap=256, tk_cap=512):
    """Pallas TPU NoisyLinear forward.

    eps_out (out_features,) and eps_in (in_features,) are the factored noise
    vectors; weight_epsilon == outer(eps_out, eps_in) as in reset_noise().
    """
    B, in_f = x.shape
    out_f, in_f2 = weight_mu.shape
    assert in_f2 == in_f

    # Pad to lane/sublane-dense shapes: B -> mult of 8, features -> mult of 128.
    Bp = _round_up(B, 8)
    in_p = _round_up(in_f, 128)
    out_p = _round_up(out_f, 128)

    tn = _pick_tile(out_p, tn_cap)     # output-feature tile (lane axis of result)
    tk = _pick_tile(in_p, tk_cap)      # reduction tile

    xp = jnp.pad(x, ((0, Bp - B), (0, in_p - in_f)))
    wmu_p = jnp.pad(weight_mu, ((0, out_p - out_f), (0, in_p - in_f)))
    bmu_p = jnp.pad(bias_mu, (0, out_p - out_f)).reshape(1, out_p)

    grid = (out_p // tn, in_p // tk)
    x_spec = pl.BlockSpec((Bp, tk), lambda j, k: (0, k))
    w_spec = pl.BlockSpec((tn, tk), lambda j, k: (j, k))
    bvec_spec = pl.BlockSpec((1, tn), lambda j, k: (0, j))
    out_spec = pl.BlockSpec((Bp, tn), lambda j, k: (0, j))
    scratch = [pltpu.VMEM((Bp, tn), jnp.float32)]
    cparams = pltpu.CompilerParams(
        dimension_semantics=("parallel", "arbitrary"))

    if training:
        wsig_p = jnp.pad(weight_sigma, ((0, out_p - out_f), (0, in_p - in_f)))
        eps_out_p = jnp.pad(eps_out, (0, out_p - out_f)).reshape(out_p, 1)
        eps_in_p = jnp.pad(eps_in, (0, in_p - in_f)).reshape(1, in_p)
        bsig_p = jnp.pad(bias_sigma, (0, out_p - out_f)).reshape(1, out_p)
        beps_p = jnp.pad(bias_epsilon, (0, out_p - out_f)).reshape(1, out_p)

        out_p_arr = pl.pallas_call(
            _noisy_linear_train_kernel,
            out_shape=jax.ShapeDtypeStruct((Bp, out_p), x.dtype),
            grid_spec=pltpu.PrefetchScalarGridSpec(
                num_scalar_prefetch=0,
                grid=grid,
                in_specs=[
                    x_spec,                                      # x
                    w_spec,                                      # weight_mu
                    w_spec,                                      # weight_sigma
                    pl.BlockSpec((tn, 1), lambda j, k: (j, 0)),  # eps_out (column)
                    pl.BlockSpec((1, tk), lambda j, k: (0, k)),  # eps_in (row)
                    bvec_spec,                                   # bias_mu
                    bvec_spec,                                   # bias_sigma
                    bvec_spec,                                   # bias_epsilon
                ],
                out_specs=out_spec,
                scratch_shapes=scratch),
            compiler_params=cparams,
        )(xp, wmu_p, wsig_p, eps_out_p, eps_in_p, bmu_p, bsig_p, beps_p)
    else:
        # Eval path: plain x @ weight_mu.T + bias_mu; no sigma/epsilon HBM traffic.
        out_p_arr = pl.pallas_call(
            _linear_eval_kernel,
            out_shape=jax.ShapeDtypeStruct((Bp, out_p), x.dtype),
            grid_spec=pltpu.PrefetchScalarGridSpec(
                num_scalar_prefetch=0,
                grid=grid,
                in_specs=[x_spec, w_spec, bvec_spec],
                out_specs=out_spec,
                scratch_shapes=scratch),
            compiler_params=cparams,
        )(xp, wmu_p, bmu_p)

    return out_p_arr[:B, :out_f]


# ---------------------------------------------------------------------------
# Deterministic parameter / noise initialization mirroring the PyTorch module.
# ---------------------------------------------------------------------------
def _scale_noise(key, size):
    # x = randn(size); x = sign(x) * sqrt(|x|)
    x = jax.random.normal(key, (size,), dtype=jnp.float32)
    return jnp.sign(x) * jnp.sqrt(jnp.abs(x))


def init_noisy_linear(key, in_features, out_features, std_init=0.4):
    k_wmu, k_bmu, k_ein, k_eout, k_beps = jax.random.split(key, 5)
    mu_range = 1.0 / math.sqrt(in_features)

    weight_mu = jax.random.uniform(k_wmu, (out_features, in_features),
                                   minval=-mu_range, maxval=mu_range,
                                   dtype=jnp.float32)
    weight_sigma = jnp.full((out_features, in_features),
                            std_init / math.sqrt(in_features), dtype=jnp.float32)
    bias_mu = jax.random.uniform(k_bmu, (out_features,),
                                 minval=-mu_range, maxval=mu_range,
                                 dtype=jnp.float32)
    bias_sigma = jnp.full((out_features,),
                          std_init / math.sqrt(out_features), dtype=jnp.float32)

    eps_in = _scale_noise(k_ein, in_features)
    eps_out = _scale_noise(k_eout, out_features)
    weight_epsilon = jnp.outer(eps_out, eps_in)          # ger(epsilon_out, epsilon_in)
    bias_epsilon = _scale_noise(k_beps, out_features)

    return dict(weight_mu=weight_mu, weight_sigma=weight_sigma,
                eps_in=eps_in, eps_out=eps_out,
                weight_epsilon=weight_epsilon,           # full buffer, for reference only
                bias_mu=bias_mu, bias_sigma=bias_sigma,
                bias_epsilon=bias_epsilon)


if __name__ == "__main__":
    key = jax.random.PRNGKey(0)
    k_params, k_x = jax.random.split(key)

    batch, in_features, out_features = 2, 32, 64
    params = init_noisy_linear(k_params, in_features, out_features)
    x = jax.random.normal(k_x, (batch, in_features), dtype=jnp.float32)

    # Training-mode forward (noisy weights).
    y_train = noisy_linear(x,
                           params["weight_mu"], params["weight_sigma"],
                           params["eps_out"], params["eps_in"],
                           params["bias_mu"], params["bias_sigma"],
                           params["bias_epsilon"],
                           training=True)
    y_train = jax.block_until_ready(y_train)

    # Eval-mode forward (mu parameters only).
    y_eval = noisy_linear(x,
                          params["weight_mu"], params["weight_sigma"],
                          params["eps_out"], params["eps_in"],
                          params["bias_mu"], params["bias_sigma"],
                          params["bias_epsilon"],
                          training=False)
    y_eval = jax.block_until_ready(y_eval)

    # Pure-JAX references matching the PyTorch module exactly.
    w_ref = params["weight_mu"] + params["weight_sigma"] * params["weight_epsilon"]
    b_ref = params["bias_mu"] + params["bias_sigma"] * params["bias_epsilon"]
    y_train_ref = x @ w_ref.T + b_ref
    y_eval_ref = x @ params["weight_mu"].T + params["bias_mu"]

    assert y_train.shape == (batch, out_features)
    assert y_eval.shape == (batch, out_features)
    assert jnp.allclose(y_train, y_train_ref, atol=1e-5, rtol=1e-5)
    assert jnp.allclose(y_eval, y_eval_ref, atol=1e-5, rtol=1e-5)

    print("KERNEL_OK")
</pallas_src>

<mosaic_0001>
module attributes {stable_mosaic.version = 11 : i64} {
  func.func @_noisy_linear_train_kernel(%arg0: i32, %arg1: i32, %arg2: memref<8x128xf32, #tpu.memory_space<vmem>>, %arg3: memref<128x128xf32, #tpu.memory_space<vmem>>, %arg4: memref<128x128xf32, #tpu.memory_space<vmem>>, %arg5: memref<128x1xf32, #tpu.memory_space<vmem>>, %arg6: memref<1x128xf32, #tpu.memory_space<vmem>>, %arg7: memref<1x128xf32, #tpu.memory_space<vmem>>, %arg8: memref<1x128xf32, #tpu.memory_space<vmem>>, %arg9: memref<1x128xf32, #tpu.memory_space<vmem>>, %arg10: memref<8x128xf32, #tpu.memory_space<vmem>>, %arg11: memref<8x128xf32, #tpu.memory_space<vmem>>) attributes {dimension_semantics = [#tpu.dimension_semantics<parallel>, #tpu.dimension_semantics<arbitrary>], iteration_bounds = array<i64: 1, 1>, scalar_prefetch = 0 : i64, scratch_operands = 1 : i64, tpu.core_type = #tpu.core_type<tc>, window_params = [{transform_indices = @transform_0, window_bounds = array<i64: 8, 128>}, {transform_indices = @transform_1, window_bounds = array<i64: 128, 128>}, {transform_indices = @transform_2, window_bounds = array<i64: 128, 128>}, {transform_indices = @transform_3, window_bounds = array<i64: 128, 1>}, {transform_indices = @transform_4, window_bounds = array<i64: 1, 128>}, {transform_indices = @transform_5, window_bounds = array<i64: 1, 128>}, {transform_indices = @transform_6, window_bounds = array<i64: 1, 128>}, {transform_indices = @transform_7, window_bounds = array<i64: 1, 128>}, {transform_indices = @transform_8, window_bounds = array<i64: 8, 128>}]} {
    %c0_i32 = arith.constant 0 : i32
    %0 = arith.cmpi eq, %arg1, %c0_i32 : i32
    %1 = arith.extui %0 : i1 to i32
    %c0_i32_0 = arith.constant 0 : i32
    %2 = arith.cmpi ne, %1, %c0_i32_0 : i32
    scf.if %2 {
      %cst_16 = arith.constant 0.000000e+00 : f32
      %20 = vector.broadcast %cst_16 : f32 to vector<8x128xf32>
      %c0_17 = arith.constant 0 : index
      %c0_18 = arith.constant 0 : index
      %21 = vector.load %arg11[%c0_17, %c0_18] : memref<8x128xf32, #tpu.memory_space<vmem>>, vector<8x128xf32>
      tpu.vector_store %arg11[%c0_17, %c0_18], %20 {strides = array<i32>} : memref<8x128xf32, #tpu.memory_space<vmem>>, vector<8x128xf32>,
    } else {
    }
    %c0 = arith.constant 0 : index
    %c0_1 = arith.constant 0 : index
    %3 = vector.load %arg5[%c0, %c0_1] : memref<128x1xf32, #tpu.memory_space<vmem>>, vector<128x1xf32>
    %c0_2 = arith.constant 0 : index
    %c0_3 = arith.constant 0 : index
    %4 = vector.load %arg6[%c0_2, %c0_3] : memref<1x128xf32, #tpu.memory_space<vmem>>, vector<1x128xf32>
    %5 = vector.broadcast %3 : vector<128x1xf32> to vector<128x128xf32>
    %6 = vector.broadcast %4 : vector<1x128xf32> to vector<128x128xf32>
    %7 = arith.mulf %5, %6 : vector<128x128xf32>
    %c0_4 = arith.constant 0 : index
    %c0_5 = arith.constant 0 : index
    %8 = vector.load %arg3[%c0_4, %c0_5] : memref<128x128xf32, #tpu.memory_space<vmem>>, vector<128x128xf32>
    %c0_6 = arith.constant 0 : index
    %c0_7 = arith.constant 0 : index
    %9 = vector.load %arg4[%c0_6, %c0_7] : memref<128x128xf32, #tpu.memory_space<vmem>>, vector<128x128xf32>
    %10 = arith.mulf %9, %7 : vector<128x128xf32>
    %11 = arith.addf %8, %10 : vector<128x128xf32>
    %c0_8 = arith.constant 0 : index
    %c0_9 = arith.constant 0 : index
    %12 = vector.load %arg11[%c0_8, %c0_9] : memref<8x128xf32, #tpu.memory_space<vmem>>, vector<8x128xf32>
    %c0_10 = arith.constant 0 : index
    %c0_11 = arith.constant 0 : index
    %13 = vector.load %arg2[%c0_10, %c0_11] : memref<8x128xf32, #tpu.memory_space<vmem>>, vector<8x128xf32>
    %cst = arith.constant dense<0.000000e+00> : vector<8x128xf32>
    %14 = tpu.matmul %13, %11, %cst {dimension_numbers = #tpu.dot_dimension_numbers<[1], [1], [0], [0], [0, 0, 1, 0], [], []>} : vector<8x128xf32>, vector<128x128xf32>, vector<8x128xf32> -> vector<8x128xf32>
    %15 = arith.addf %12, %14 : vector<8x128xf32>
    %c0_12 = arith.constant 0 : index
    %c0_13 = arith.constant 0 : index
    %16 = vector.load %arg11[%c0_12, %c0_13] : memref<8x128xf32, #tpu.memory_space<vmem>>, vector<8x128xf32>
    tpu.vector_store %arg11[%c0_12, %c0_13], %15 {strides = array<i32>} : memref<8x128xf32, #tpu.memory_space<vmem>>, vector<8x128xf32>,
    %c0_i32_14 = arith.constant 0 : i32
    %17 = arith.cmpi eq, %arg1, %c0_i32_14 : i32
    %18 = arith.extui %17 : i1 to i32
    %c0_i32_15 = arith.constant 0 : i32
    %19 = arith.cmpi ne, %18, %c0_i32_15 : i32
    scf.if %19 {
      %c0_16 = arith.constant 0 : index
      %c0_17 = arith.constant 0 : index
      %20 = vector.load %arg7[%c0_16, %c0_17] : memref<1x128xf32, #tpu.memory_space<vmem>>, vector<1x128xf32>
      %c0_18 = arith.constant 0 : index
      %c0_19 = arith.constant 0 : index
      %21 = vector.load %arg8[%c0_18, %c0_19] : memref<1x128xf32, #tpu.memory_space<vmem>>, vector<1x128xf32>
      %c0_20 = arith.constant 0 : index
      %c0_21 = arith.constant 0 : index
      %22 = vector.load %arg9[%c0_20, %c0_21] : memref<1x128xf32, #tpu.memory_space<vmem>>, vector<1x128xf32>
      %23 = arith.mulf %21, %22 : vector<1x128xf32>
      %24 = arith.addf %20, %23 : vector<1x128xf32>
      %c0_22 = arith.constant 0 : index
      %c0_23 = arith.constant 0 : index
      %25 = vector.load %arg11[%c0_22, %c0_23] : memref<8x128xf32, #tpu.memory_space<vmem>>, vector<8x128xf32>
      %26 = vector.broadcast %24 : vector<1x128xf32> to vector<8x128xf32>
      %27 = arith.addf %25, %26 : vector<8x128xf32>
      %c0_24 = arith.constant 0 : index
      %c0_25 = arith.constant 0 : index
      %28 = vector.load %arg10[%c0_24, %c0_25] : memref<8x128xf32, #tpu.memory_space<vmem>>, vector<8x128xf32>
      tpu.vector_store %arg10[%c0_24, %c0_25], %27 {strides = array<i32>} : memref<8x128xf32, #tpu.memory_space<vmem>>, vector<8x128xf32>,
    } else {
    }
    return
  }
  func.func @transform_0(%arg0: i32, %arg1: i32) -> (i32, i32) {
    %c0_i32 = arith.constant 0 : i32
    %c0_i32_0 = arith.constant 0 : i32
    return %c0_i32, %arg1 : i32, i32
  }
  func.func @transform_1(%arg0: i32, %arg1: i32) -> (i32, i32) {
    %c0_i32 = arith.constant 0 : i32
    return %arg0, %arg1 : i32, i32
  }
  func.func @transform_2(%arg0: i32, %arg1: i32) -> (i32, i32) {
    %c0_i32 = arith.constant 0 : i32
    return %arg0, %arg1 : i32, i32
  }
  func.func @transform_3(%arg0: i32, %arg1: i32) -> (i32, i32) {
    %c0_i32 = arith.constant 0 : i32
    %c0_i32_0 = arith.constant 0 : i32
    return %arg0, %c0_i32 : i32, i32
  }
  func.func @transform_4(%arg0: i32, %arg1: i32) -> (i32, i32) {
    %c0_i32 = arith.constant 0 : i32
    %c0_i32_0 = arith.constant 0 : i32
    return %c0_i32, %arg1 : i32, i32
  }
  func.func @transform_5(%arg0: i32, %arg1: i32) -> (i32, i32) {
    %c0_i32 = arith.constant 0 : i32
    %c0_i32_0 = arith.constant 0 : i32
    return %c0_i32, %arg0 : i32, i32
  }
  func.func @transform_6(%arg0: i32, %arg1: i32) -> (i32, i32) {
    %c0_i32 = arith.constant 0 : i32
    %c0_i32_0 = arith.constant 0 : i32
    return %c0_i32, %arg0 : i32, i32
  }
  func.func @transform_7(%arg0: i32, %arg1: i32) -> (i32, i32) {
    %c0_i32 = arith.constant 0 : i32
    %c0_i32_0 = arith.constant 0 : i32
    return %c0_i32, %arg0 : i32, i32
  }
  func.func @transform_8(%arg0: i32, %arg1: i32) -> (i32, i32) {
    %c0_i32 = arith.constant 0 : i32
    %c0_i32_0 = arith.constant 0 : i32
    return %c0_i32, %arg0 : i32, i32
  }
}

</mosaic_0001>

<bundles_post_ra>
// kernel: tpu_custom_call.1
= control target key start
LH: loop header
LB: loop body
LE: loop exit
PB: predicated region body
PF: predicated region fallthrough
CT: control target
= control target key end

     0   :  { %13 = vsyncpa [#allocation4], 0  ;;  %s742_s0 = inlined_call_operand.hbm [shape: f32[8,128], index: 0, kind: input, shape index: {}]   ;;  %s743_s1 = inlined_call_operand.vmem [shape: f32[128,128], index: 1, kind: input, shape index: {}]   ;;  %s744_s2 = inlined_call_operand.hbm [shape: f32[128,128], index: 2, kind: input, shape index: {}]   ;;  %s745_s3 = inlined_call_operand.vmem [shape: f32[128,1], index: 3, kind: input, shape index: {}]   ;;  %s746_s4 = inlined_call_operand.vmem [shape: f32[1,128], index: 4, kind: input, shape index: {}]   ;;  %s747_s5 = inlined_call_operand.vmem [shape: f32[1,128], index: 5, kind: input, shape index: {}]   ;;  %s748_s6 = inlined_call_operand.vmem [shape: f32[1,128], index: 6, kind: input, shape index: {}]   ;;  %s749_s7 = inlined_call_operand.vmem [shape: f32[1,128], index: 7, kind: input, shape index: {}]   ;;  %s750_s8 = inlined_call_operand.hbm [shape: f32[8,128], index: 8, kind: output, shape index: {}]  }
   0x1   :  { %14 = vsyncpa [#allocation7], 0 }
   0x2   :  { %15 = vsyncpa [#allocation5], 0  ;;  %s511_s27 = smov [#allocation3]   ;;  %s512_s29 = smov [#allocation6]  }
   0x3   :  { %s22_s28 = sshll.u32 %s511_s27, 4  ;;  %s33_s30 = sshll.u32 %s512_s29, 4  ;;  %s23_s28 = int_to_ptr.vmem [resolvable:$true] %s22_s28  ;;  %s565_s30 = int_to_ptr.vmem [resolvable:$true] %s33_s30 }
   0x4   :  { %s439_s11 = scalar_lea.hbm %s742_s0, 128 }
   0x5   :  { %p440_p0 = scmp.ne.s32.totalorder %s742_s0, %s439_s11  ;;  %p443_p1 = scmp.lt.u32.totalorder %s439_s11, %s742_s0 }
   0x7   :  { %p445_p2 = pnand %p443_p1, %p440_p0 }
   0x9   :  { %448 = shalt.err (!%p445_p2)
}
   0xa   :  { %s449_s16 = scalar_lea.vmem %s23_s28, 128  ;;  %p454_p4 = scmp.lt.s32.totalorder %s23_s28, %s23_s28 }
   0xb   :  { %p450_p3 = scmp.ne.s32.totalorder %s23_s28, %s449_s16  ;;  %p455_p5 = scmp.lt.s32.totalorder %s449_s16, %s449_s16 }
   0xd   :  { %p456_p6 = por %p455_p5, %p454_p4 }
   0xf   :  { %p457_p7 = pnand %p456_p6, %p450_p3 }
  0x11   :  { %460 = shalt.err (!%p457_p7)
}
  0x12   :  { %25 = dma.hbm_to_vmem [thread:$0]  %s742_s0, 128, %s23_s28, [#allocation4]  }
  0x13   :  { %s461_s21 = scalar_lea.hbm %s744_s2, 2048 }
  0x14   :  { %p462_p8 = scmp.ne.s32.totalorder %s744_s2, %s461_s21  ;;  %p465_p9 = scmp.lt.u32.totalorder %s461_s21, %s744_s2 }
  0x16   :  { %p467_p10 = pnand %p465_p9, %p462_p8 }
  0x18   :  { %470 = shalt.err (!%p467_p10)
}
  0x19   :  { %s471_s26 = scalar_lea.vmem %s565_s30, 2048  ;;  %p476_p12 = scmp.lt.s32.totalorder %s565_s30, %s565_s30 }
  0x1a   :  { %p472_p11 = scmp.ne.s32.totalorder %s565_s30, %s471_s26  ;;  %p477_p13 = scmp.lt.s32.totalorder %s471_s26, %s471_s26 }
  0x1c   :  { %p478_p0 = por %p477_p13, %p476_p12 }
  0x1e   :  { %p479_p1 = pnand %p478_p0, %p472_p11 }
  0x20   :  { %482 = shalt.err (!%p479_p1)
}
  0x21   :  { %s513_s0 = smov 128   ;;  %s514_s27 = smov 8  }
  0x22   :  { %39 = dma.hbm_to_vmem [thread:$0]  %s744_s2, 2048, %s565_s30, [#allocation7], %s513_s0, %s513_s0, %s514_s27  }
  0x23   :  { %505 = dma.done.wait [#allocation4], 128  }
  0x24   :  { %506 = vsyncadd [#allocation4], 4294967168 }
  0x25   :  { %507 = dma.done.wait [#allocation7], 2048  }
  0x26   :  { %508 = vsyncadd [#allocation7], 4294965248  ;;  %v515_v0 = vmov 0   ;;  %v63_v1 = vld [vmem:[%s745_s3 + $0x10] sm:$0xff]  ;;  %v61_v2 = vld [vmem:[%s745_s3] sm:$0xff]  ;;  %v516_v9 = vmov 0.0|0.0  }
  0x27   :  { %438 = vset.pattern.permute.xlu1 %v515_v0  ;;  %437 = vset.pattern.permute.xlu0 %v515_v0  ;;  %v64_v3 = vld [vmem:[%s745_s3 + $0x18] sm:$0xff]  ;;  %v62_v4 = vld [vmem:[%s745_s3 + $0x8] sm:$0xff]  ;;  %v65_v6 = vld [vmem:[%s745_s3 + $0x20] sm:$0xff]  ;;  %vm517_vm0 = vmmov 0   ;;  %v518_v18 = vmov 0.0   ;;  %s519_s26 = smov [#allocation8]  }
  0x28   :  { %90 = vperm.xlu1 %438, %v63_v1   ;;  %80 = vperm.xlu0 %437, %v61_v2   ;;  %v66_v5 = vld [vmem:[%s745_s3 + $0x28] sm:$0xff]  ;;  %v68_v7 = vld [vmem:[%s745_s3 + $0x38] sm:$0xff]  ;;  %v67_v8 = vld [vmem:[%s745_s3 + $0x30] sm:$0xff]  ;;  %s341_s0 = sshll.u32 %s519_s26, 4  ;;  %s342_s0 = int_to_ptr.vmem [resolvable:$true] %s341_s0 }
  0x29   :  { %404 = vmatprep.subr.bf16.mxu0 %v516_v9  ;;  %v70_v10 = vld [vmem:[%s745_s3 + $0x48] sm:$0xff]  ;;  %v69_v11 = vld [vmem:[%s745_s3 + $0x40] sm:$0xff]  ;;  %v72_v12 = vld [vmem:[%s745_s3 + $0x58] sm:$0xff]  ;;  %401 = vmatprep.mubr.msk.f32.mxu0 %vm517_vm0, %v518_v18  ;;  %p488_p3 = scmp.lt.s32.totalorder %s342_s0, %s342_s0 }
  0x2a   :  { %v71_v13 = vld [vmem:[%s745_s3 + $0x50] sm:$0xff]  ;;  %v74_v14 = vld [vmem:[%s745_s3 + $0x68] sm:$0xff]  ;;  %v73_v15 = vld [vmem:[%s745_s3 + $0x60] sm:$0xff] }
  0x2b   :  { %v76_v16 = vld [vmem:[%s745_s3 + $0x78] sm:$0xff]  ;;  %v75_v17 = vld [vmem:[%s745_s3 + $0x70] sm:$0xff]  ;;  %v648_v19 = vld [vmem:[%s746_s4] ss:$0 sm:$0xff] }
  0x2c   :  { %95 = vperm.xlu1 %438, %v64_v3   ;;  %85 = vperm.xlu0 %437, %v62_v4   ;;  %v196_v23 = vld [vmem:[#allocation6] sm:$0xff]  ;;  %v197_v24 = vld [vmem:[#allocation6 + $0x8] sm:$0xff]  ;;  %v180_v29 = vld [vmem:[%s743_s1] sm:$0xff] }
  0x2d   :  { %v181_v30 = vld [vmem:[%s743_s1 + $0x8] sm:$0xff]  ;;  %v198_v34 = vld [vmem:[#allocation6 + $0x10] sm:$0xff]  ;;  %v199_v35 = vld [vmem:[#allocation6 + $0x18] sm:$0xff] }
  0x2e   :  { %v182_v41 = vld [vmem:[%s743_s1 + $0x10] sm:$0xff]  ;;  %v183_v42 = vld [vmem:[%s743_s1 + $0x18] sm:$0xff]  ;;  %v200_v50 = vld [vmem:[#allocation6 + $0x20] sm:$0xff] }
  0x2f   :  { %v201_v49 = vld [vmem:[#allocation6 + $0x28] sm:$0xff]  ;;  %v185_v54 = vld [vmem:[%s743_s1 + $0x28] sm:$0xff]  ;;  %v184_v55 = vld [vmem:[%s743_s1 + $0x20] sm:$0xff] }
  0x30   :  { %105 = vperm.xlu1 %438, %v66_v5   ;;  %100 = vperm.xlu0 %437, %v65_v6   ;;  %v203_v62 = vld [vmem:[#allocation6 + $0x38] sm:$0xff]  ;;  %v202_v63 = vld [vmem:[#allocation6 + $0x30] sm:$0xff]  ;;  %v186_v4 = vld [vmem:[%s743_s1 + $0x30] sm:$0xff] }
  0x31   :  { %v187_v3 = vld [vmem:[%s743_s1 + $0x38] sm:$0xff]  ;;  %v188_v18 = vld [vmem:[%s743_s1 + $0x40] sm:$0xff] }
  0x34   :  { %115 = vperm.xlu1 %438, %v68_v7   ;;  %110 = vperm.xlu0 %437, %v67_v8  }
  0x38   :  { %125 = vperm.xlu1 %438, %v70_v10   ;;  %120 = vperm.xlu0 %437, %v69_v11  }
  0x3c   :  { %135 = vperm.xlu1 %438, %v72_v12   ;;  %130 = vperm.xlu0 %437, %v71_v13   ;;  %v205_v12 = vld [vmem:[#allocation6 + $0x48] sm:$0xff]  ;;  %v204_v13 = vld [vmem:[#allocation6 + $0x40] sm:$0xff] }
  0x40   :  { %145 = vperm.xlu1 %438, %v74_v14   ;;  %140 = vperm.xlu0 %437, %v73_v15  }
  0x44   :  { %155 = vperm.xlu1 %438, %v76_v16   ;;  %150 = vperm.xlu0 %437, %v75_v17   ;;  %v189_v17 = vld [vmem:[%s743_s1 + $0x48] sm:$0xff] }
  0xa7   :  { %v91_v20 = vpop.permute.xlu1 %90  ;;  %v81_v21 = vpop.permute.xlu0 %80 }
  0xa8   :  { %v164_v22 = vmul.f32 %v648_v19, %v81_v21  ;;  %v166_v31 = vmul.f32 %v648_v19, %v91_v20 }
  0xaa   :  { %v212_v26 = vmul.f32 %v196_v23, %v164_v22  ;;  %v214_v38 = vmul.f32 %v198_v34, %v166_v31  ;;  %v191_v31 = vld [vmem:[%s743_s1 + $0x58] sm:$0xff] }
  0xab   :  { %v86_v25 = vpop.permute.xlu0 %85  ;;  %v96_v28 = vpop.permute.xlu1 %95 }
  0xac   :  { %v165_v27 = vmul.f32 %v648_v19, %v86_v25  ;;  %v167_v32 = vmul.f32 %v648_v19, %v96_v28  ;;  %v228_v36 = vadd.f32 %v212_v26, %v180_v29  ;;  %v230_v45 = vadd.f32 %v214_v38, %v182_v41  ;;  %v207_v26 = vld [vmem:[#allocation6 + $0x58] sm:$0xff] }
  0xae   :  { %v213_v33 = vmul.f32 %v197_v24, %v165_v27  ;;  %v215_v39 = vmul.f32 %v199_v35, %v167_v32  ;;  %v206_v27 = vld [vmem:[#allocation6 + $0x50] sm:$0xff]  ;;  %v190_v32 = vld [vmem:[%s743_s1 + $0x50] sm:$0xff] }
  0xaf   :  { %v106_v43 = vpop.permute.xlu1 %105  ;;  %v101_v44 = vpop.permute.xlu0 %100 }
  0xb0   :  { %v229_v37 = vadd.f32 %v213_v33, %v181_v30  ;;  %v231_v46 = vadd.f32 %v215_v39, %v183_v42  ;;  %v169_v47 = vmul.f32 %v648_v19, %v106_v43  ;;  %v168_v48 = vmul.f32 %v648_v19, %v101_v44  ;;  %v209_v39 = vld [vmem:[#allocation6 + $0x68] sm:$0xff]  ;;  %v193_v44 = vld [vmem:[%s743_s1 + $0x68] sm:$0xff] }
  0xb2   :  { %v405_v40 = vpack.c.bf16 %v229_v37, %v228_v36  ;;  %v217_v51 = vmul.f32 %v201_v49, %v169_v47  ;;  %v216_v52 = vmul.f32 %v200_v50, %v168_v48  ;;  %v408_v53 = vpack.c.bf16 %v231_v46, %v230_v45  ;;  %v192_v45 = vld [vmem:[%s743_s1 + $0x60] sm:$0xff] }
  0xb3   :  { %v116_v56 = vpop.permute.xlu1 %115  ;;  %v111_v57 = vpop.permute.xlu0 %110 }
  0xb4   :  { %406 = vmatpush3.bf16.xpose.msra.mxu0 %v405_v40  ;;  %v233_v58 = vadd.f32 %v217_v51, %v185_v54  ;;  %v232_v59 = vadd.f32 %v216_v52, %v184_v55  ;;  %v171_v60 = vmul.f32 %v648_v19, %v116_v56  ;;  %v170_v61 = vmul.f32 %v648_v19, %v111_v57  ;;  %v208_v40 = vld [vmem:[#allocation6 + $0x60] sm:$0xff]  ;;  %v211_v52 = vld [vmem:[#allocation6 + $0x78] sm:$0xff]  ;;  %v195_v57 = vld [vmem:[%s743_s1 + $0x78] sm:$0xff] }
  0xb5   :  { %407 = vmatprep.subr.bf16.mxu0 %v516_v9 }
  0xb6   :  { %v219_v0 = vmul.f32 %v203_v62, %v171_v60  ;;  %v218_v1 = vmul.f32 %v202_v63, %v170_v61  ;;  %v411_v2 = vpack.c.bf16 %v233_v58, %v232_v59  ;;  %v194_v58 = vld [vmem:[%s743_s1 + $0x70] sm:$0xff]  ;;  %v328_v62 = vlaneseq  ;;  %v322_v63 = vld [vmem:[%s748_s6] sm:$0x1]  ;;  %s483_s6 = scalar_lea.vmem %s342_s0, 128 }
  0xb7   :  { %v126_v5 = vpop.permute.xlu1 %125  ;;  %v121_v6 = vpop.permute.xlu0 %120  ;;  %p484_p2 = scmp.ne.s32.totalorder %s342_s0, %s483_s6  ;;  %p489_p4 = scmp.lt.s32.totalorder %s483_s6, %s483_s6 }
  0xb8   :  { %v235_v7 = vadd.f32 %v219_v0, %v187_v3  ;;  %v234_v8 = vadd.f32 %v218_v1, %v186_v4  ;;  %v173_v10 = vmul.f32 %v648_v19, %v126_v5  ;;  %v172_v11 = vmul.f32 %v648_v19, %v121_v6  ;;  %v323_v0 = vld [vmem:[%s749_s7] sm:$0x1] }
  0xb9   :  { %v324_v1 = vmul.f32 %v323_v0, %v322_v63  ;;  %p490_p5 = por %p489_p4, %p488_p3 }
  0xba   :  { %v221_v14 = vmul.f32 %v205_v12, %v173_v10  ;;  %v220_v15 = vmul.f32 %v204_v13, %v172_v11  ;;  %v414_v16 = vpack.c.bf16 %v235_v7, %v234_v8 }
  0xbb   :  { %v136_v20 = vpop.permute.xlu1 %135  ;;  %v131_v21 = vpop.permute.xlu0 %130  ;;  %p491_p6 = pnand %p490_p5, %p484_p2 }
  0xbc   :  { %409 = vmatpush3.bf16.xpose.msra.mxu0 %v408_v53  ;;  %v237_v22 = vadd.f32 %v221_v14, %v189_v17  ;;  %v236_v23 = vadd.f32 %v220_v15, %v188_v18  ;;  %v175_v24 = vmul.f32 %v648_v19, %v136_v20  ;;  %v174_v25 = vmul.f32 %v648_v19, %v131_v21  ;;  %v210_v53 = vld [vmem:[#allocation6 + $0x70] sm:$0xff] }
  0xbd   :  { %410 = vmatprep.subr.bf16.mxu0 %v516_v9 }
  0xbe   :  { %v223_v28 = vmul.f32 %v207_v26, %v175_v24  ;;  %v222_v29 = vmul.f32 %v206_v27, %v174_v25  ;;  %v417_v30 = vpack.c.bf16 %v237_v22, %v236_v23 }
  0xbf   :  { %v146_v33 = vpop.permute.xlu1 %145  ;;  %v141_v34 = vpop.permute.xlu0 %140 }
  0xc0   :  { %v239_v35 = vadd.f32 %v223_v28, %v191_v31  ;;  %v238_v36 = vadd.f32 %v222_v29, %v190_v32  ;;  %v177_v37 = vmul.f32 %v648_v19, %v146_v33  ;;  %v176_v38 = vmul.f32 %v648_v19, %v141_v34 }
  0xc2   :  { %v225_v41 = vmul.f32 %v209_v39, %v177_v37  ;;  %v224_v42 = vmul.f32 %v208_v40, %v176_v38  ;;  %v420_v43 = vpack.c.bf16 %v239_v35, %v238_v36 }
  0xc3   :  { %v156_v46 = vpop.permute.xlu1 %155  ;;  %v151_v47 = vpop.permute.xlu0 %150 }
  0xc4   :  { %412 = vmatpush3.bf16.xpose.msra.mxu0 %v411_v2  ;;  %v241_v48 = vadd.f32 %v225_v41, %v193_v44  ;;  %v240_v49 = vadd.f32 %v224_v42, %v192_v45  ;;  %v179_v50 = vmul.f32 %v648_v19, %v156_v46  ;;  %v178_v51 = vmul.f32 %v648_v19, %v151_v47  ;;  %v245_v19 = vld [vmem:[#allocation3] sm:$0xff] }
  0xc5   :  { %413 = vmatprep.subr.bf16.mxu0 %v516_v9  ;;  %v329_v2 = vshrl.u32 %v328_v62, 7 }
  0xc6   :  { %v227_v54 = vmul.f32 %v211_v52, %v179_v50  ;;  %v226_v55 = vmul.f32 %v210_v53, %v178_v51  ;;  %v423_v56 = vpack.c.bf16 %v241_v48, %v240_v49 }
  0xc7   :  { %v330_v4 = vsub.s32 0, %v329_v2 }
  0xc8   :  { %v243_v59 = vadd.f32 %v227_v54, %v195_v57  ;;  %v242_v60 = vadd.f32 %v226_v55, %v194_v58 }
  0xca   :  { %v426_v61 = vpack.c.bf16 %v243_v59, %v242_v60 }
  0xcc   :  { %415 = vmatpush3.bf16.xpose.msra.mxu0 %v414_v16 }
  0xcd   :  { %416 = vmatprep.subr.bf16.mxu0 %v516_v9 }
  0xd4   :  { %418 = vmatpush3.bf16.xpose.msra.mxu0 %v417_v30 }
  0xd5   :  { %419 = vmatprep.subr.bf16.mxu0 %v516_v9 }
  0xdc   :  { %421 = vmatpush3.bf16.xpose.msra.mxu0 %v420_v43 }
  0xdd   :  { %422 = vmatprep.subr.bf16.mxu0 %v516_v9 }
  0xe4   :  { %424 = vmatpush3.bf16.xpose.msra.mxu0 %v423_v56 }
  0xe5   :  { %425 = vmatprep.subr.bf16.mxu0 %v516_v9  ;;  %v321_v9 = vld [vmem:[%s747_s5] sm:$0x1] }
  0xe6   :  { %v325_v3 = vadd.f32 %v324_v1, %v321_v9 }
  0xe8   :  { %v331_v5 = vrot.slane %v325_v3, %v330_v4 }
  0xec   :  { %427 = vmatpush3.bf16.xpose.msra.mxu0 %v426_v61 }
  0xf3   :  { %402 = vmatmul.mubr.f32.vlgmr.msra.gmra.mrb[0].mxu0 %v245_v19 }
 0x1c6   :  { %v312_v6 = vpop.f32.mrb[0].mxu0 }
 0x1c7   :  { %v333_v7 = vadd.f32 %v331_v5, %v312_v6  ;;  %v403_v8 = vpop.f32.mrb[1].mxu0 }
 0x1c9   :  { %334 = vst [vmem:[#allocation8] sm:$0xff] %v333_v7 }
 0x1ca   :  { %494 = shalt.err (!%p491_p6)
}
 0x1cb   :  { %s495_s5 = scalar_lea.hbm %s750_s8, 128 }
 0x1cc   :  { %p496_p7 = scmp.ne.s32.totalorder %s750_s8, %s495_s5  ;;  %p499_p8 = scmp.lt.u32.totalorder %s495_s5, %s750_s8 }
 0x1ce   :  { %p501_p9 = pnand %p499_p8, %p496_p7 }
 0x1d0   :  { %504 = shalt.err (!%p501_p9)
}
 0x1d1   :  { %344 = dma.vmem_to_hbm [thread:$0]  %s342_s0, 128, %s750_s8, [#allocation5]  }
 0x1d2   :  { %509 = dma.done.wait [#allocation5], 128  }
 0x1d3   :  { %510 = vsyncadd [#allocation5], 4294967168 }
 0x1d4   :  { %348 = vsyncpa [#allocation4], 1 }
 0x1d5   :  { %349 = vsyncpa [#allocation7], 1 }
 0x1d6   :  { %350 = vsyncpa [#allocation5], 1 }

</bundles_post_ra>
